<compile_context>
chip_gen: v6e
topology: v6e:2x2x1
jax: 0.10.0
libtpu: 0.0.40
codegen_flags: <defaults>
</compile_context>

<pallas_src>
import jax
import jax.numpy as jnp
from jax import lax
from jax.experimental import pallas as pl
from jax.experimental.pallas import tpu as pltpu


# ---------------------------------------------------------------------------
# Tile selection (budget-derived, per perf review)
# ---------------------------------------------------------------------------
_VMEM_BLOCK_BUDGET = 24 * 1024 * 1024   # double-buffered in+out blocks (v7x-safe)
_TARGET_OUT_BYTES = 2 * 1024 * 1024     # aim ~1-4 MiB of output writes per step
_MAX_LANE_TILE = 4096                   # keep enough grid steps for megacore
_MAX_BATCH_TILE = 16                    # bound on in-kernel unroll over the N block


def _choose_tiles(N, C, C_out, L, itemsize, halo):
    """Pick (Bn, T): lane tile T (multiple of `halo`) and batch tile Bn so that
    each grid step moves ~1-4 MiB of output while the double-buffered block
    footprint stays well under the smallest (v7x) VMEM window."""
    L_pad = pl.cdiv(L, halo) * halo

    def blocks_bytes(Bn, T):
        in_b = Bn * C * (T + 2 * halo) * itemsize      # centre + 2 halo blocks
        out_b = Bn * C_out * T * itemsize
        return 2 * (in_b + out_b)                      # double buffered

    def out_bytes(Bn, T):
        return Bn * C_out * T * itemsize

    T = halo
    while (T * 2 <= min(L_pad, _MAX_LANE_TILE)
           and blocks_bytes(1, T * 2) <= _VMEM_BLOCK_BUDGET
           and out_bytes(1, T) < _TARGET_OUT_BYTES):
        T *= 2
    Bn = 1
    while (Bn * 2 <= min(N, _MAX_BATCH_TILE)
           and blocks_bytes(Bn * 2, T) <= _VMEM_BLOCK_BUDGET
           and out_bytes(Bn, T) < _TARGET_OUT_BYTES):
        Bn *= 2
    return Bn, T


# ---------------------------------------------------------------------------
# Kernels
# ---------------------------------------------------------------------------
def _make_tiled_kernel(Bn, C, C_out, L, T, halo, stride, nb_shifts):
    """Lane-tiled kernel.  Block refs: xl/xr halos (Bn,C,halo), centre (Bn,C,T),
    output (Bn,C_out,T).  All cross-tile data comes from the two halos."""
    W = T + 2 * halo

    def kernel(xl_ref, xc_ref, xr_ref, o_ref):
        tile_start = pl.program_id(1) * T

        lane = lax.broadcasted_iota(jnp.int32, (C, T), 1)
        gpos = lane + tile_start                       # global position along L
        zeros = jnp.zeros((C, T), dtype=o_ref.dtype)

        # Boundary masks are identical for every batch row in the block; the
        # interior-tile case makes them all-true (cheap vsel, HBM-bound anyway).
        masks = []
        for n in range(nb_shifts):
            m = (n + 1) * stride
            masks.append((gpos + m < L, gpos >= m))

        for b in range(Bn):                            # static unroll over N block
            xc = xc_ref[b]                             # (C, T)
            # [left halo | centre | right halo]; all pieces are 128-aligned so
            # this concat is relayout-free.  xfull[:, q] == x[tile_start-halo+q].
            xfull = jnp.concatenate([xl_ref[b], xc, xr_ref[b]], axis=1)   # (C, W)

            # slab 0: identity copy
            o_ref[b, 0:C, :] = xc

            for n in range(nb_shifts):
                m = (n + 1) * stride
                row_l = (1 + 2 * n) * C
                row_r = (2 + 2 * n) * C
                if m >= L:                             # shift spans whole sequence
                    o_ref[b, row_l:row_l + C, :] = zeros
                    o_ref[b, row_r:row_r + C, :] = zeros
                    continue
                mask_l, mask_r = masks[n]

                # shift "left":  out[p] = x[p + m]  (zero-fill at the end)
                sl = pltpu.roll(xfull, shift=(W - halo - m) % W, axis=1)[:, :T]
                o_ref[b, row_l:row_l + C, :] = jnp.where(mask_l, sl, zeros)

                # shift "right": out[p] = x[p - m]  (zero-fill at the start)
                sr = pltpu.roll(xfull, shift=(W - halo + m) % W, axis=1)[:, :T]
                o_ref[b, row_r:row_r + C, :] = jnp.where(mask_r, sr, zeros)

    return kernel


def _make_fallback_kernel(C, L, stride, nb_shifts):
    """Single-block path for tiny sequences (L < halo width)."""
    def kernel(x_ref, o_ref):
        x = x_ref[0]                                   # (C, L)
        zeros = jnp.zeros((C, L), dtype=o_ref.dtype)
        o_ref[0, 0:C, :] = x
        for n in range(nb_shifts):
            m = (n + 1) * stride
            row_l = (1 + 2 * n) * C
            row_r = (2 + 2 * n) * C
            if m >= L:
                o_ref[0, row_l:row_l + C, :] = zeros
                o_ref[0, row_r:row_r + C, :] = zeros
                continue
            pad = jnp.zeros((C, m), dtype=o_ref.dtype)
            o_ref[0, row_l:row_l + C, :] = jnp.concatenate([x[:, m:], pad], axis=1)
            o_ref[0, row_r:row_r + C, :] = jnp.concatenate([pad, x[:, :L - m]], axis=1)
    return kernel


# ---------------------------------------------------------------------------
# Wrapper
# ---------------------------------------------------------------------------
def shift1d_nch(x, stride_input=3, nb_shifts=3, *, lane_tile=None, batch_tile=None):
    """Pallas forward of Shift1d_nch.  x: (N, C, L) -> (N, C*(2*nb_shifts+1), L)."""
    N, C, L = x.shape
    C_out = C * (2 * nb_shifts + 1)
    max_shift = nb_shifts * stride_input
    itemsize = jnp.dtype(x.dtype).itemsize
    out_shape = jax.ShapeDtypeStruct((N, C_out, L), x.dtype)

    # Halo width: smallest multiple of 128 lanes covering the largest shift.
    halo = 128 * max(1, -(-max_shift // 128))

    if L < halo:
        # Tiny sequences: one (C_out, L) block per batch element (perf moot).
        kernel = _make_fallback_kernel(C, L, stride_input, nb_shifts)
        return pl.pallas_call(
            kernel,
            out_shape=out_shape,
            grid_spec=pltpu.PrefetchScalarGridSpec(
                num_scalar_prefetch=0,
                grid=(N,),
                in_specs=[pl.BlockSpec((1, C, L), lambda i: (i, 0, 0))],
                out_specs=pl.BlockSpec((1, C_out, L), lambda i: (i, 0, 0)),
            ),
            compiler_params=pltpu.CompilerParams(
                dimension_semantics=("parallel",),
                vmem_limit_bytes=32 * 1024 * 1024,
            ),
        )(x)

    Bn, T = _choose_tiles(N, C, C_out, L, itemsize, halo)
    if lane_tile is not None:
        if lane_tile < halo or lane_tile % halo != 0:
            raise ValueError("lane_tile must be a positive multiple of the halo width")
        T = lane_tile
    if batch_tile is not None:
        Bn = batch_tile

    k = T // halo                                      # lane tile in halo units
    n_halo_blocks = pl.cdiv(L, halo)
    grid = (pl.cdiv(N, Bn), pl.cdiv(L, T))             # ragged L/N handled by masks

    kernel = _make_tiled_kernel(Bn, C, C_out, L, T, halo, stride_input, nb_shifts)
    in_specs = [
        # left halo: the `halo` lanes just before this tile (edge-clamped; the
        # clamped values are masked away in the kernel).
        pl.BlockSpec((Bn, C, halo), lambda i, j: (i, 0, jnp.maximum(j * k - 1, 0))),
        # centre tile
        pl.BlockSpec((Bn, C, T), lambda i, j: (i, 0, j)),
        # right halo: the `halo` lanes just after this tile (edge-clamped).
        pl.BlockSpec((Bn, C, halo),
                     lambda i, j: (i, 0, jnp.minimum((j + 1) * k, n_halo_blocks - 1))),
    ]
    # TODO(synk): if xprof ever shows exposed writeback gaps, bump this stream
    # to pipeline_mode=pl.Buffered(3).
    out_specs = pl.BlockSpec((Bn, C_out, T), lambda i, j: (i, 0, j))

    return pl.pallas_call(
        kernel,
        out_shape=out_shape,
        grid_spec=pltpu.PrefetchScalarGridSpec(
            num_scalar_prefetch=0,
            grid=grid,
            in_specs=in_specs,
            out_specs=out_specs,
        ),
        compiler_params=pltpu.CompilerParams(
            dimension_semantics=("parallel", "parallel"),
            vmem_limit_bytes=32 * 1024 * 1024,
        ),
    )(x, x, x)


# ---------------------------------------------------------------------------
# Pure-JAX reference (mirrors the PyTorch module) and self-test
# ---------------------------------------------------------------------------
def shift1d_nch_reference(x, stride_input=3, nb_shifts=3):
    N, C, L = x.shape
    outs = [x]
    for n in range(nb_shifts):
        m = (n + 1) * stride_input
        left = jnp.pad(x, ((0, 0), (0, 0), (0, m)))[:, :, m:]
        right = jnp.pad(x, ((0, 0), (0, 0), (m, 0)))[:, :, :L]
        outs.append(left)
        outs.append(right)
    return jnp.concatenate(outs, axis=1)


if __name__ == "__main__":
    stride_input, nb_shifts = 3, 3
    C_mult = 2 * nb_shifts + 1
    key = jax.random.PRNGKey(0)

    # 1) tiny shape (N, C, L) consistent with the module -> fallback path.
    x_small = jax.random.normal(key, (2, 4, 16), dtype=jnp.float32)
    out_small = jax.block_until_ready(shift1d_nch(x_small, stride_input, nb_shifts))
    ref_small = shift1d_nch_reference(x_small, stride_input, nb_shifts)
    assert out_small.shape == (2, 4 * C_mult, 16), out_small.shape
    assert jnp.array_equal(out_small, ref_small), "small-shape mismatch vs reference"

    # 2) lane-tiled path with automatic (Bn, T) selection (batched over N).
    x_mid = jax.random.normal(key, (2, 4, 1024), dtype=jnp.float32)
    out_mid = jax.block_until_ready(shift1d_nch(x_mid, stride_input, nb_shifts))
    ref_mid = shift1d_nch_reference(x_mid, stride_input, nb_shifts)
    assert out_mid.shape == (2, 4 * C_mult, 1024), out_mid.shape
    assert jnp.array_equal(out_mid, ref_mid), "auto-tiled mismatch vs reference"

    # 3) multi-tile + ragged L: exercises the halo blocks and boundary masks.
    x_rag = jax.random.normal(key, (2, 4, 1000), dtype=jnp.float32)
    out_rag = jax.block_until_ready(
        shift1d_nch(x_rag, stride_input, nb_shifts, lane_tile=256, batch_tile=1))
    ref_rag = shift1d_nch_reference(x_rag, stride_input, nb_shifts)
    assert out_rag.shape == (2, 4 * C_mult, 1000), out_rag.shape
    assert jnp.array_equal(out_rag, ref_rag), "ragged/multi-tile mismatch vs reference"

    print("KERNEL_OK")
</pallas_src>

<mosaic_0001>
module attributes {stable_mosaic.version = 11 : i64} {
  func.func @kernel(%arg0: i32, %arg1: memref<1x4x16xf32, #tpu.memory_space<vmem>>, %arg2: memref<1x28x16xf32, #tpu.memory_space<vmem>>) attributes {dimension_semantics = [#tpu.dimension_semantics<parallel>], iteration_bounds = array<i64: 2>, scalar_prefetch = 0 : i64, scratch_operands = 0 : i64, tpu.core_type = #tpu.core_type<tc>, window_params = [{transform_indices = @transform_0, window_bounds = array<i64: 1, 4, 16>}, {transform_indices = @transform_1, window_bounds = array<i64: 1, 28, 16>}]} {
    %c0 = arith.constant 0 : index
    %c0_0 = arith.constant 0 : index
    %c0_1 = arith.constant 0 : index
    %0 = vector.load %arg1[%c0, %c0_0, %c0_1] : memref<1x4x16xf32, #tpu.memory_space<vmem>>, vector<1x4x16xf32>
    %1 = vector.shape_cast %0 : vector<1x4x16xf32> to vector<4x16xf32>
    %c0_2 = arith.constant 0 : index
    %c0_3 = arith.constant 0 : index
    %c0_4 = arith.constant 0 : index
    %2 = vector.load %arg2[%c0_2, %c0_3, %c0_4] : memref<1x28x16xf32, #tpu.memory_space<vmem>>, vector<1x4x16xf32>
    %3 = vector.shape_cast %2 : vector<1x4x16xf32> to vector<4x16xf32>
    %4 = vector.shape_cast %1 : vector<4x16xf32> to vector<1x4x16xf32>
    tpu.vector_store %arg2[%c0_2, %c0_3, %c0_4], %4 {strides = array<i32>} : memref<1x28x16xf32, #tpu.memory_space<vmem>>, vector<1x4x16xf32>,
    %cst = arith.constant 0.000000e+00 : f32
    %5 = vector.broadcast %cst : f32 to vector<4x3xf32>
    %6 = vector.extract_strided_slice %1 {offsets = [0, 3], sizes = [4, 13], strides = [1, 1]} : vector<4x16xf32> to vector<4x13xf32>
    %7 = tpu.concatenate %6, %5 in 1 : vector<4x13xf32>, vector<4x3xf32> -> vector<4x16xf32>
    %c0_5 = arith.constant 0 : index
    %c4 = arith.constant 4 : index
    %c0_6 = arith.constant 0 : index
    %8 = vector.load %arg2[%c0_5, %c4, %c0_6] : memref<1x28x16xf32, #tpu.memory_space<vmem>>, vector<1x4x16xf32>
    %9 = vector.shape_cast %8 : vector<1x4x16xf32> to vector<4x16xf32>
    %10 = vector.shape_cast %7 : vector<4x16xf32> to vector<1x4x16xf32>
    tpu.vector_store %arg2[%c0_5, %c4, %c0_6], %10 {strides = array<i32>} : memref<1x28x16xf32, #tpu.memory_space<vmem>>, vector<1x4x16xf32>,
    %11 = vector.extract_strided_slice %1 {offsets = [0, 0], sizes = [4, 13], strides = [1, 1]} : vector<4x16xf32> to vector<4x13xf32>
    %12 = tpu.concatenate %5, %11 in 1 : vector<4x3xf32>, vector<4x13xf32> -> vector<4x16xf32>
    %c0_7 = arith.constant 0 : index
    %c8 = arith.constant 8 : index
    %c0_8 = arith.constant 0 : index
    %13 = vector.load %arg2[%c0_7, %c8, %c0_8] : memref<1x28x16xf32, #tpu.memory_space<vmem>>, vector<1x4x16xf32>
    %14 = vector.shape_cast %13 : vector<1x4x16xf32> to vector<4x16xf32>
    %15 = vector.shape_cast %12 : vector<4x16xf32> to vector<1x4x16xf32>
    tpu.vector_store %arg2[%c0_7, %c8, %c0_8], %15 {strides = array<i32>} : memref<1x28x16xf32, #tpu.memory_space<vmem>>, vector<1x4x16xf32>,
    %cst_9 = arith.constant 0.000000e+00 : f32
    %16 = vector.broadcast %cst_9 : f32 to vector<4x6xf32>
    %17 = vector.extract_strided_slice %1 {offsets = [0, 6], sizes = [4, 10], strides = [1, 1]} : vector<4x16xf32> to vector<4x10xf32>
    %18 = tpu.concatenate %17, %16 in 1 : vector<4x10xf32>, vector<4x6xf32> -> vector<4x16xf32>
    %c0_10 = arith.constant 0 : index
    %c12 = arith.constant 12 : index
    %c0_11 = arith.constant 0 : index
    %19 = vector.load %arg2[%c0_10, %c12, %c0_11] : memref<1x28x16xf32, #tpu.memory_space<vmem>>, vector<1x4x16xf32>
    %20 = vector.shape_cast %19 : vector<1x4x16xf32> to vector<4x16xf32>
    %21 = vector.shape_cast %18 : vector<4x16xf32> to vector<1x4x16xf32>
    tpu.vector_store %arg2[%c0_10, %c12, %c0_11], %21 {strides = array<i32>} : memref<1x28x16xf32, #tpu.memory_space<vmem>>, vector<1x4x16xf32>,
    %22 = vector.extract_strided_slice %1 {offsets = [0, 0], sizes = [4, 10], strides = [1, 1]} : vector<4x16xf32> to vector<4x10xf32>
    %23 = tpu.concatenate %16, %22 in 1 : vector<4x6xf32>, vector<4x10xf32> -> vector<4x16xf32>
    %c0_12 = arith.constant 0 : index
    %c16 = arith.constant 16 : index
    %c0_13 = arith.constant 0 : index
    %24 = vector.load %arg2[%c0_12, %c16, %c0_13] : memref<1x28x16xf32, #tpu.memory_space<vmem>>, vector<1x4x16xf32>
    %25 = vector.shape_cast %24 : vector<1x4x16xf32> to vector<4x16xf32>
    %26 = vector.shape_cast %23 : vector<4x16xf32> to vector<1x4x16xf32>
    tpu.vector_store %arg2[%c0_12, %c16, %c0_13], %26 {strides = array<i32>} : memref<1x28x16xf32, #tpu.memory_space<vmem>>, vector<1x4x16xf32>,
    %cst_14 = arith.constant 0.000000e+00 : f32
    %27 = vector.broadcast %cst_14 : f32 to vector<4x9xf32>
    %28 = vector.extract_strided_slice %1 {offsets = [0, 9], sizes = [4, 7], strides = [1, 1]} : vector<4x16xf32> to vector<4x7xf32>
    %29 = tpu.concatenate %28, %27 in 1 : vector<4x7xf32>, vector<4x9xf32> -> vector<4x16xf32>
    %c0_15 = arith.constant 0 : index
    %c20 = arith.constant 20 : index
    %c0_16 = arith.constant 0 : index
    %30 = vector.load %arg2[%c0_15, %c20, %c0_16] : memref<1x28x16xf32, #tpu.memory_space<vmem>>, vector<1x4x16xf32>
    %31 = vector.shape_cast %30 : vector<1x4x16xf32> to vector<4x16xf32>
    %32 = vector.shape_cast %29 : vector<4x16xf32> to vector<1x4x16xf32>
    tpu.vector_store %arg2[%c0_15, %c20, %c0_16], %32 {strides = array<i32>} : memref<1x28x16xf32, #tpu.memory_space<vmem>>, vector<1x4x16xf32>,
    %33 = vector.extract_strided_slice %1 {offsets = [0, 0], sizes = [4, 7], strides = [1, 1]} : vector<4x16xf32> to vector<4x7xf32>
    %34 = tpu.concatenate %27, %33 in 1 : vector<4x9xf32>, vector<4x7xf32> -> vector<4x16xf32>
    %c0_17 = arith.constant 0 : index
    %c24 = arith.constant 24 : index
    %c0_18 = arith.constant 0 : index
    %35 = vector.load %arg2[%c0_17, %c24, %c0_18] : memref<1x28x16xf32, #tpu.memory_space<vmem>>, vector<1x4x16xf32>
    %36 = vector.shape_cast %35 : vector<1x4x16xf32> to vector<4x16xf32>
    %37 = vector.shape_cast %34 : vector<4x16xf32> to vector<1x4x16xf32>
    tpu.vector_store %arg2[%c0_17, %c24, %c0_18], %37 {strides = array<i32>} : memref<1x28x16xf32, #tpu.memory_space<vmem>>, vector<1x4x16xf32>,
    return
  }
  func.func @transform_0(%arg0: i32) -> (i32, i32, i32) {
    %c0_i32 = arith.constant 0 : i32
    %c0_i32_0 = arith.constant 0 : i32
    %c0_i32_1 = arith.constant 0 : i32
    return %arg0, %c0_i32, %c0_i32_0 : i32, i32, i32
  }
  func.func @transform_1(%arg0: i32) -> (i32, i32, i32) {
    %c0_i32 = arith.constant 0 : i32
    %c0_i32_0 = arith.constant 0 : i32
    %c0_i32_1 = arith.constant 0 : i32
    return %arg0, %c0_i32, %c0_i32_0 : i32, i32, i32
  }
}

</mosaic_0001>

<bundles_post_ra>
// kernel: tpu_custom_call.1
= control target key start
LH: loop header
LB: loop body
LE: loop exit
PB: predicated region body
PF: predicated region fallthrough
CT: control target
= control target key end

     0   :  { %6 = vsyncpa [#allocation3], 0  ;;  %s495_s0 = inlined_call_operand.hbm [shape: f32[2,4,16], index: 0, kind: input, shape index: {}]   ;;  %s496_s1 = inlined_call_operand.vmem [shape: f32[2,28,16], index: 1, kind: output, shape index: {}]  }
   0x1   :  { %8 = vsyncpa [#allocation3 + $0x1], 0  ;;  %s379_s6 = smov 0   ;;  %s381_s7 = smov 0  }
   0x2   :  { %s383_s8 = smov 0   ;;  %s385_s9 = smov 0  }
   0x3 LB: > { %s398_s10 = sadd.s32 4294967295, %s360_s9   ;;  %s401_s11 = sadd.s32 1, %s360_s9   ;;  %s360_s9 = sphi %s385_s9, %s506_s9   ;;  %s356_s8 = sphi %s383_s8, %s505_s8   ;;  %s352_s7 = sphi %s381_s7, %s504_s7   ;;  %s348_s6 = sphi %s379_s6, %s503_s6  }
   0x4   : > { %s18_s12 = ssub.s32 %s360_s9, %s401_s11  ;;  %s21_s13 = sadd.s32 1, %s356_s8 }
   0x5   : > { %p19_p0 = scmp.eq.s32.totalorder %s18_s12, 0  ;;  %p28_p1 = scmp.ne.s32.totalorder %s356_s8, %s352_s7 }
   0x6   : > { %p29_p2 = scmp.eq.s32.totalorder %s360_s9, 0  ;;  %p34_p3 = scmp.ne.s32.totalorder %s352_s7, %s348_s6 }
   0x7   : > { %s411_s14 = scalar_select %p19_p0, %s356_s8, %s21_s13  }
   0x8   : > { %p30_p4 = por %p29_p2, %p28_p1  ;;  %p35_p5 = scmp.eq.s32.totalorder %s398_s10, 0 }
   0x9   : > { %p259_p6 = scmp.lt.s32.totalorder %s360_s9, 2  ;;  %s84_s16 = sand.u32 1, %s356_s8  }
   0xa   : > { %p415_p7 = por %p35_p5, %p34_p3  ;;  %s244_s17 = sshll.u32 %s84_s16, 2 }
   0xb   : > { %s245_s18 = sshll.u32 %s360_s9, 6  ;;  %s88_s22 = scalar_lea.vmem [#allocation2], %s244_s17 }
   0xc   : > { %s498_s15 = scalar_select %p415_p7, 1, 0 }
   0xd   : > { %s424_s21 = scalar_lea.hbm %s495_s0, %s245_s18  ;;  %s95_s23 = sshll.u32 %s88_s22, 4  ;;  %s426_s23 = int_to_ptr.vmem [resolvable:$true] %s95_s23 }
   0xe   : > { %p428_p8 = pnand %p259_p6, %p30_p4  ;;  %s85_s25 = scalar_lea.sflag [#allocation3], %s84_s16 }
   0xf   : > { %s298_s26 = scalar_lea.hbm %s424_s21, 64  ;;  %s303_s29 = scalar_lea.hbm %s495_s0, 128 }
  0x10   : > { %p299_p11 = scmp.ne.s32.totalorder %s424_s21, %s298_s26  ;;  %p300_p12 = pneg %p428_p8 }
  0x11   : > { %p304_p1 = scmp.lt.s32.totalorder %s424_s21, %s495_s0  ;;  %p305_p2 = scmp.lt.s32.totalorder %s303_s29, %s298_s26 }
  0x12   : > { %p301_p13 = pnand %p300_p12, %p299_p11 }
  0x13   : > { %p306_p3 = por %p305_p2, %p304_p1 }
  0x14   : > { %p302_p0 = pneg %p301_p13 }
  0x16   : > { %p307_p4 = pnand %p306_p3, %p302_p0 }
  0x18   : > { %310 = shalt.err (!%p307_p4)
}
  0x19   : > { %s311_s3 = scalar_lea.vmem %s426_s23, 64  ;;  %s362_s4 = smov [#allocation2]  }
  0x1a   : > { %p312_p5 = scmp.ne.s32.totalorder %s426_s23, %s311_s3  ;;  %s316_s5 = sshll.u32 %s362_s4, 4  ;;  %s317_s5 = int_to_ptr.vmem [resolvable:$false] %s316_s5 }
  0x1b   : > { %s318_s6 = scalar_lea.vmem %s317_s5, 128  ;;  %p319_p13 = scmp.lt.s32.totalorder %s426_s23, %s317_s5 }
  0x1c   : > { %p314_p6 = pnand %p312_p5, %p300_p12  ;;  %p320_p9 = scmp.lt.s32.totalorder %s318_s6, %s311_s3 }
  0x1e   : > { %p315_p11 = pneg %p314_p6  ;;  %p321_p10 = por %p320_p9, %p319_p13 }
  0x20   : > { %p322_p7 = pnand %p321_p10, %p315_p11 }
  0x22   : > { %325 = shalt.err (!%p322_p7)
}
  0x23   : > { %258 = dma.hbm_to_vmem [thread:$0]  (!%p428_p8), %s424_s21, 64, %s426_s23, %s85_s25  }
  0x24   : > { %p500_p0 = scmp.lt.s32.totalorder %s360_s9, 3  ;;  %p501_p1 = scmp.ge.s32.totalorder %s360_s9, 1 }
  0x26   : > { %p101_p12 = pnand %p501_p1, %p500_p0 }
  0x27   : > { %s106_s12 = sand.u32 (!%p101_p12), 1, %s352_s7   ;;  %p502_p9 = scmp.ne.s32.totalorder (!%p101_p12), %s498_s15, 0 }
  0x28   : > { %104 = sbr.rel (%p101_p12) target bundleno = 173 (0xad), region = 24  ;;  %s247_s13 = sshll.u32 (!%p101_p12), %s106_s12, 2 }
  0x29   : > { %s107_s16 = scalar_lea.sflag (!%p101_p12), [#allocation3], %s106_s12  ;;  %s110_s17 = scalar_lea.vmem (!%p101_p12), [#allocation2], %s247_s13 }
  0x2d   : > { %343 = dma.done.wait (%p502_p9), %s107_s16, 64  }
  0x2e   : > { %345 = vsyncadd (%p502_p9), %s107_s16, 4294967232  ;;  %p129_p7 = scmp.lt.s32.totalorder %s398_s10, 1  ;;  %v134_v0 = vld [vmem:[%s110_s17] sm:$0xf]  ;;  %vm135_vm0 = vcmask 125952   ;;  %s363_s21 = smov 122  }
  0x2f   : > { %150 = vrot.lane.b32.xlu1 %v134_v0, %s363_s21  ;;  %s364_s22 = smov 125   ;;  %s365_s15 = smov 6   ;;  %vm153_vm1 = vcmask 80896   ;;  %vm141_vm2 = vcmask 105472   ;;  %vm159_vm3 = vcmask 48128   ;;  %vm147_vm4 = vcmask 23552  }
  0x30   : > { %s508_s10 = smov (!%p129_p7, %s398_s10), 1  ;;  %138 = vrot.lane.b32.xlu0 %v134_v0, %s364_s22  ;;  %s366_s23 = smov 3   ;;  %vm171_vm5 = vcmask 72704   ;;  %vm165_vm6 = vcmask 56320  }
  0x31   : > { %s252_s18 = sshll.u32 %s508_s10, 5  ;;  %s367_s10 = smov 9  }
  0x32   : > { %s466_s20 = scalar_lea.vmem %s496_s1, %s252_s18  ;;  %s368_s24 = smov 119  }
  0x33   : > { %136 = vst.msk [vmem:[%s466_s20] sm:$0xf] %vm135_vm0, %v134_v0  ;;  %156 = vrot.lane.b32.xlu1 %v134_v0, %s365_s15 }
  0x34   : > { %144 = vrot.lane.b32.xlu0 %v134_v0, %s366_s23 }
  0x37   : > { %168 = vrot.lane.b32.xlu1 %v134_v0, %s367_s10 }
  0x38   : > { %162 = vrot.lane.b32.xlu0 %v134_v0, %s368_s24 }
  0xa1   : > { %v151_v1 = vpop.permute.xlu1 %150 }
  0xa2   : > { %v139_v2 = vpop.permute.xlu0 %138  ;;  %v154_v3 = vsel %vm153_vm1, %v151_v1, 0.0 }
  0xa3   : > { %v142_v4 = vsel %vm141_vm2, %v139_v2, 0.0  ;;  %155 = vst.msk [vmem:[%s466_s20 + $0xc] sm:$0xf] %vm135_vm0, %v154_v3 }
  0xa4   : > { %143 = vst.msk [vmem:[%s466_s20 + $0x4] sm:$0xf] %vm135_vm0, %v142_v4 }
  0xa5   : > { %v157_v5 = vpop.permute.xlu1 %156 }
  0xa6   : > { %v145_v6 = vpop.permute.xlu0 %144  ;;  %v160_v7 = vsel %vm159_vm3, 0.0, %v157_v5 }
  0xa7   : > { %v148_v8 = vsel %vm147_vm4, 0.0, %v145_v6  ;;  %161 = vst.msk [vmem:[%s466_s20 + $0x10] sm:$0xf] %vm135_vm0, %v160_v7 }
  0xa8   : > { %149 = vst.msk [vmem:[%s466_s20 + $0x8] sm:$0xf] %vm135_vm0, %v148_v8 }
  0xa9   : > { %v169_v9 = vpop.permute.xlu1 %168 }
  0xaa   : > { %v163_v10 = vpop.permute.xlu0 %162  ;;  %v172_v11 = vsel %vm171_vm5, 0.0, %v169_v9 }
  0xab   : > { %v166_v12 = vsel %vm165_vm6, %v163_v10, 0.0  ;;  %173 = vst.msk [vmem:[%s466_s20 + $0x18] sm:$0xf] %vm135_vm0, %v172_v11 }
  0xac   : > { %167 = vst.msk [vmem:[%s466_s20 + $0x14] sm:$0xf] %vm135_vm0, %v166_v12 }
  0xad PF: > { %p11_p8 = scmp.ge.s32.totalorder %s401_s11, 4   ;;  %s503_s6 = smov %s352_s7 }
  0xae   : > { %s504_s7 = smov %s356_s8  ;;  %s505_s8 = smov %s411_s14 }
  0xaf   : > { %s506_s9 = smov %s401_s11  ;;  %13 = sbr.rel (!%p11_p8) target bundleno = 3 (0x3), region = 64 }
  0xb4   :  { %195 = vsyncpa [#allocation3], 1 }
  0xb5   :  { %197 = vsyncpa [#allocation3 + $0x1], 1 }

</bundles_post_ra>
